<compile_context>
chip_gen: v6e
topology: v6e:2x2x1
jax: 0.10.0
libtpu: 0.0.40
codegen_flags: <defaults>
</compile_context>

<pallas_src>
import jax
import jax.numpy as jnp
from jax.experimental import pallas as pl
from jax.experimental.pallas import tpu as pltpu

EPS = 1e-5


# ----------------------------- glue helpers ---------------------------------

def _build_patches(x):
    """X5[b, c, p, u, v] = zero-padded 5x5 neighbourhood of spatial position p=(i,j).

    Equivalent to nn.Unfold(kernel_size=(5,5), padding=2) followed by the
    rearrange in the module forward.
    """
    B, C, H, W = x.shape
    xp = jnp.pad(x, ((0, 0), (0, 0), (2, 2), (2, 2)))
    cols = [xp[:, :, i:i + 5, j:j + 5] for i in range(H) for j in range(W)]
    return jnp.stack(cols, axis=2)  # (B, C, H*W, 5, 5)


def _fold_bn(w_mat, bias, gamma, beta, mean, var):
    """Fold inference BatchNorm into (weight, bias).  w_mat: (K, Cout)."""
    s = gamma / jnp.sqrt(var + EPS)
    return w_mat * s[None, :], bias * s + beta - mean * s


def _pick_block_batch(B, P, C, target_rows=256, vmem_budget=24 << 20):
    """Pick how many batch elements to pack per grid step.

    Targets M = BB*P >= ~256 rows to fill the MXU, keeps >=2 grid steps when
    possible (megacore / dual TensorCore), and caps the double-buffered
    activation footprint to a conservative VMEM budget.
    """
    def step_bytes(bb):  # a5 + idn + out, double-buffered, f32
        return 2 * bb * P * (C * 25 + 2 * C) * 4

    target_bb = max(1, -(-target_rows // P))  # ceil(target_rows / P)
    divisors = [d for d in range(1, B + 1) if B % d == 0]
    cands = [d for d in divisors if d <= target_bb and step_bytes(d) <= vmem_budget] or [1]
    bb = max(cands)
    if B // bb < 2:  # prefer >=2 grid steps so both TCs (v7x) get work
        two_step = [d for d in cands if B // d >= 2]
        if two_step:
            bb = max(two_step)
    return bb


# ------------------------------- kernel --------------------------------------

def _iis_kernel(a5_ref, idn_ref,
                wa_ref, ba_ref,        # fused layer-1: [conv3 (9 windows) | conv5]
                w2_ref, b2_ref,        # conv3 layer-2, rows zero-padded to 10*C1
                w5_ref, b5_ref,        # conv5 layer-2, rows zero-padded to 10*C1
                o_ref):
    a5 = a5_ref[0]                                   # (M, C*25) im2col slab, M = BB*25

    # ---- fused first layer: one matmul feeding both branches ----
    # (M, C*25) @ (C*25, 10*C1) -> +bias -> ReLU   (BN folded into weights)
    y = jnp.dot(a5, wa_ref[...], preferred_element_type=jnp.float32) + ba_ref[...]
    y = jnp.maximum(y, 0.0)                          # (M, 10*C1)

    # ---- second layers: zero-padded weights pick out each branch's columns ----
    out3 = jnp.dot(y, w2_ref[...], preferred_element_type=jnp.float32) + b2_ref[...]
    out3 = jnp.maximum(out3, 0.0)                    # (M, C); mean over 1x1 == identity
    out5 = jnp.dot(y, w5_ref[...], preferred_element_type=jnp.float32) + b5_ref[...]
    out5 = jnp.maximum(out5, 0.0)                    # (M, C)

    # ---- gating tail ----
    g = jnp.minimum(out3 * out5, 1.0)                # x[x > 1] = 1
    d = 1.0 - g
    o_ref[0] = jnp.maximum(idn_ref[0] - d * d, 0.0)  # relu(identity - (1-x)^2)


# ------------------------------- wrapper --------------------------------------

def iis_forward(x, params, *, block_batch=None):
    B, C, H, W = x.shape
    assert H == 5 and W == 5, "IIS unfold/rearrange requires 5x5 spatial input"
    P = H * W
    C1 = params["w1"].shape[0]
    K1 = 9 * C1
    KA = 10 * C1                                     # fused first-layer width

    BB = block_batch if block_batch is not None else _pick_block_batch(B, P, C)
    assert B % BB == 0
    NG = B // BB                                     # grid steps
    M = BB * P                                       # matmul rows per step

    # --- data rearrangement (only the 5x5 im2col; 3x3 windows fold into weights) ---
    X5 = _build_patches(x)                                           # (B, C, 25, 5, 5)
    A5 = X5.transpose(0, 2, 1, 3, 4).reshape(NG, M, C * 25)          # (NG, M, C*25)
    idn = x.reshape(B, C, P).transpose(0, 2, 1).reshape(NG, M, C)    # (NG, M, C)

    # --- conv3 layer-1: 3x3 weights zero-padded into the 5x5 patch, 9 windows ---
    # w1_big[c*25 + i*5 + j, q*C1 + o] = w1[o, c, i-oh, j-ow] for q = oh*3+ow
    w1_ = params["w1"][:, :, 0].astype(jnp.float32)                  # (C1, C, 3, 3)
    blocks = [jnp.pad(w1_, ((0, 0), (0, 0), (oh, 2 - oh), (ow, 2 - ow)))
              for oh in range(3) for ow in range(3)]                 # 9 x (C1, C, 5, 5)
    w1_big = jnp.stack(blocks, 0).transpose(2, 3, 4, 0, 1).reshape(C * 25, K1)
    g1, be1, m1, v1 = params["bn1"]
    s1 = g1 / jnp.sqrt(v1 + EPS)
    w1f = w1_big * jnp.tile(s1, 9)[None, :]
    b1f = jnp.tile(params["b1"] * s1 + be1 - m1 * s1, 9)             # (9*C1,)

    # --- conv5 layer-1: dense (C*25, C1) ---
    w51m = params["w51"].reshape(C1, C * 25).T                       # (C*25, C1)
    w51f, b51f = _fold_bn(w51m, params["b51"], *params["bn51"])

    # --- fused first-layer weight / bias ---
    wa = jnp.concatenate([w1f, w51f], axis=1)                        # (C*25, 10*C1)
    ba = jnp.concatenate([b1f, b51f]).reshape(1, KA)

    # --- conv3 layer-2: (9*C1, C), zero rows for the conv5 slot of y ---
    # w2_big[q*C1 + d, out] = w2[out, d, ki, kj] for q = ki*3+kj
    w2_ = params["w2"][:, :, 0].astype(jnp.float32)                  # (C, C1, 3, 3)
    w2_big = w2_.transpose(2, 3, 1, 0).reshape(K1, C)
    g2, be2, m2, v2 = params["bn2"]
    s2 = g2 / jnp.sqrt(v2 + EPS)
    w2f = jnp.pad(w2_big * s2[None, :], ((0, C1), (0, 0)))           # (10*C1, C)
    b2f = (params["b2"] * s2 + be2 - m2 * s2).reshape(1, C)

    # --- conv5 layer-2: (C1, C), zero rows for the conv3 slots of y ---
    w52m = params["w52"].reshape(C, C1).T                            # (C1, C)
    w52f_, b52f = _fold_bn(w52m, params["b52"], *params["bn52"])
    w52f = jnp.pad(w52f_, ((K1, 0), (0, 0)))                         # (10*C1, C)
    b52f = b52f.reshape(1, C)

    # NOTE: activations/weights kept in f32 (bf16 would halve HBM traffic on
    # v6e/v7x but loosens the 1e-4 accuracy contract).
    out = pl.pallas_call(
        _iis_kernel,
        out_shape=jax.ShapeDtypeStruct((NG, M, C), jnp.float32),
        grid=(NG,),
        in_specs=[
            pl.BlockSpec((1, M, C * 25), lambda b: (b, 0, 0)),   # A5 slab
            pl.BlockSpec((1, M, C), lambda b: (b, 0, 0)),        # identity
            pl.BlockSpec((C * 25, KA), lambda b: (0, 0)),        # weights: constant block
            pl.BlockSpec((1, KA), lambda b: (0, 0)),             #   -> resident, no re-DMA
            pl.BlockSpec((KA, C), lambda b: (0, 0)),
            pl.BlockSpec((1, C), lambda b: (0, 0)),
            pl.BlockSpec((KA, C), lambda b: (0, 0)),
            pl.BlockSpec((1, C), lambda b: (0, 0)),
        ],
        out_specs=pl.BlockSpec((1, M, C), lambda b: (b, 0, 0)),
        compiler_params=pltpu.CompilerParams(dimension_semantics=("parallel",)),
    )(A5, idn, wa, ba, w2f, b2f, w52f, b52f)

    # (NG, M, C) -> (B, P, C) -> NCHW
    return out.reshape(B, P, C).transpose(0, 2, 1).reshape(B, C, H, W)


# ---------------------------- pure-JAX reference ------------------------------

def iis_reference(x, params):
    B, C, H, W = x.shape
    X5 = _build_patches(x)                                       # (B, C, 25, 5, 5)

    def bn_relu(y, bn):
        g, be, m, v = bn
        sh = (1, -1) + (1,) * (y.ndim - 2)
        y = (y - m.reshape(sh)) / jnp.sqrt(v.reshape(sh) + EPS) * g.reshape(sh) + be.reshape(sh)
        return jnp.maximum(y, 0.0)

    w1 = params["w1"][:, :, 0]
    y1 = jnp.stack([jnp.stack([
        jnp.einsum('ocuv,bcpuv->bop', w1, X5[:, :, :, oh:oh + 3, ow:ow + 3])
        for ow in range(3)], axis=-1) for oh in range(3)], axis=-2)
    y1 = bn_relu(y1 + params["b1"].reshape(1, -1, 1, 1, 1), params["bn1"])
    w2 = params["w2"][:, :, 0]
    o3 = jnp.einsum('odij,bdpij->bop', w2, y1) + params["b2"].reshape(1, -1, 1)
    o3 = bn_relu(o3, params["bn2"])

    w51 = params["w51"][:, :, 0]
    z1 = jnp.einsum('ocuv,bcpuv->bop', w51, X5) + params["b51"].reshape(1, -1, 1)
    z1 = bn_relu(z1, params["bn51"])
    w52 = params["w52"][:, :, 0, 0, 0]
    o5 = jnp.einsum('od,bdp->bop', w52, z1) + params["b52"].reshape(1, -1, 1)
    o5 = bn_relu(o5, params["bn52"])

    g = o3 * o5
    g = jnp.where(g > 1.0, 1.0, g).reshape(B, C, H, W)
    return jnp.maximum(x - (1.0 - g) ** 2, 0.0)


# ---------------------------------- main --------------------------------------

if __name__ == "__main__":
    B, C, num = 2, 4, 2
    H = W = 5                     # required by the module's unfold/rearrange
    C1 = C // num

    key = jax.random.PRNGKey(0)
    keys = jax.random.split(key, 16)

    def nrm(k, shape, scale=0.3):
        return (jax.random.normal(k, shape) * scale).astype(jnp.float32)

    def bn_params(k, n):
        k1, k2, k3, k4 = jax.random.split(k, 4)
        gamma = 1.0 + 0.1 * jax.random.normal(k1, (n,)).astype(jnp.float32)
        beta = 0.1 * jax.random.normal(k2, (n,)).astype(jnp.float32)
        mean = 0.1 * jax.random.normal(k3, (n,)).astype(jnp.float32)
        var = 0.5 + jnp.abs(jax.random.normal(k4, (n,))).astype(jnp.float32)
        return (gamma, beta, mean, var)

    params = {
        "w1": nrm(keys[0], (C1, C, 1, 3, 3)),
        "b1": nrm(keys[1], (C1,)),
        "bn1": bn_params(keys[2], C1),
        "w2": nrm(keys[3], (C, C1, 1, 3, 3)),
        "b2": nrm(keys[4], (C,)),
        "bn2": bn_params(keys[5], C),
        "w51": nrm(keys[6], (C1, C, 1, 5, 5)),
        "b51": nrm(keys[7], (C1,)),
        "bn51": bn_params(keys[8], C1),
        "w52": nrm(keys[9], (C, C1, 1, 1, 1)),
        "b52": nrm(keys[10], (C,)),
        "bn52": bn_params(keys[11], C),
    }

    x = jax.random.normal(keys[12], (B, C, H, W), dtype=jnp.float32)

    out = jax.jit(lambda xx: iis_forward(xx, params))(x)
    out = jax.block_until_ready(out)

    ref = iis_reference(x, params)
    assert out.shape == (B, C, H, W)
    max_err = float(jnp.max(jnp.abs(out - ref)))
    assert max_err < 1e-4, f"kernel/reference mismatch: {max_err}"

    print("KERNEL_OK")
</pallas_src>

<mosaic_0001>
module attributes {stable_mosaic.version = 11 : i64} {
  func.func @_iis_kernel(%arg0: i32, %arg1: memref<1x25x100xf32, #tpu.memory_space<vmem>>, %arg2: memref<1x25x4xf32, #tpu.memory_space<vmem>>, %arg3: memref<100x20xf32, #tpu.memory_space<vmem>>, %arg4: memref<1x20xf32, #tpu.memory_space<vmem>>, %arg5: memref<20x4xf32, #tpu.memory_space<vmem>>, %arg6: memref<1x4xf32, #tpu.memory_space<vmem>>, %arg7: memref<20x4xf32, #tpu.memory_space<vmem>>, %arg8: memref<1x4xf32, #tpu.memory_space<vmem>>, %arg9: memref<1x25x4xf32, #tpu.memory_space<vmem>>) attributes {dimension_semantics = [#tpu.dimension_semantics<parallel>], iteration_bounds = array<i64: 2>, scalar_prefetch = 0 : i64, scratch_operands = 0 : i64, tpu.core_type = #tpu.core_type<tc>, window_params = [{transform_indices = @transform_0, window_bounds = array<i64: 1, 25, 100>}, {transform_indices = @transform_1, window_bounds = array<i64: 1, 25, 4>}, {pipeline_mode = #tpu.pipeline_mode<synchronous>, transform_indices = @transform_2, window_bounds = array<i64: 100, 20>}, {pipeline_mode = #tpu.pipeline_mode<synchronous>, transform_indices = @transform_3, window_bounds = array<i64: 1, 20>}, {pipeline_mode = #tpu.pipeline_mode<synchronous>, transform_indices = @transform_4, window_bounds = array<i64: 20, 4>}, {pipeline_mode = #tpu.pipeline_mode<synchronous>, transform_indices = @transform_5, window_bounds = array<i64: 1, 4>}, {pipeline_mode = #tpu.pipeline_mode<synchronous>, transform_indices = @transform_6, window_bounds = array<i64: 20, 4>}, {pipeline_mode = #tpu.pipeline_mode<synchronous>, transform_indices = @transform_7, window_bounds = array<i64: 1, 4>}, {transform_indices = @transform_8, window_bounds = array<i64: 1, 25, 4>}]} {
    %c0 = arith.constant 0 : index
    %c0_0 = arith.constant 0 : index
    %c0_1 = arith.constant 0 : index
    %0 = vector.load %arg1[%c0, %c0_0, %c0_1] : memref<1x25x100xf32, #tpu.memory_space<vmem>>, vector<1x25x100xf32>
    %1 = vector.shape_cast %0 : vector<1x25x100xf32> to vector<25x100xf32>
    %c0_2 = arith.constant 0 : index
    %c0_3 = arith.constant 0 : index
    %2 = vector.load %arg3[%c0_2, %c0_3] : memref<100x20xf32, #tpu.memory_space<vmem>>, vector<100x20xf32>
    %cst = arith.constant dense<0.000000e+00> : vector<25x20xf32>
    %3 = tpu.matmul %1, %2, %cst {dimension_numbers = #tpu.dot_dimension_numbers<[1], [0], [0], [1], [0, 0, 1, 1], [], []>} : vector<25x100xf32>, vector<100x20xf32>, vector<25x20xf32> -> vector<25x20xf32>
    %c0_4 = arith.constant 0 : index
    %c0_5 = arith.constant 0 : index
    %4 = vector.load %arg4[%c0_4, %c0_5] : memref<1x20xf32, #tpu.memory_space<vmem>>, vector<1x20xf32>
    %5 = vector.broadcast %4 : vector<1x20xf32> to vector<25x20xf32>
    %6 = arith.addf %3, %5 : vector<25x20xf32>
    %cst_6 = arith.constant 0.000000e+00 : f32
    %7 = vector.broadcast %cst_6 : f32 to vector<25x20xf32>
    %8 = arith.maximumf %6, %7 : vector<25x20xf32>
    %c0_7 = arith.constant 0 : index
    %c0_8 = arith.constant 0 : index
    %9 = vector.load %arg5[%c0_7, %c0_8] : memref<20x4xf32, #tpu.memory_space<vmem>>, vector<20x4xf32>
    %cst_9 = arith.constant dense<0.000000e+00> : vector<25x4xf32>
    %10 = tpu.matmul %8, %9, %cst_9 {dimension_numbers = #tpu.dot_dimension_numbers<[1], [0], [0], [1], [0, 0, 1, 1], [], []>} : vector<25x20xf32>, vector<20x4xf32>, vector<25x4xf32> -> vector<25x4xf32>
    %c0_10 = arith.constant 0 : index
    %c0_11 = arith.constant 0 : index
    %11 = vector.load %arg6[%c0_10, %c0_11] : memref<1x4xf32, #tpu.memory_space<vmem>>, vector<1x4xf32>
    %12 = vector.broadcast %11 : vector<1x4xf32> to vector<25x4xf32>
    %13 = arith.addf %10, %12 : vector<25x4xf32>
    %cst_12 = arith.constant 0.000000e+00 : f32
    %14 = vector.broadcast %cst_12 : f32 to vector<25x4xf32>
    %15 = arith.maximumf %13, %14 : vector<25x4xf32>
    %c0_13 = arith.constant 0 : index
    %c0_14 = arith.constant 0 : index
    %16 = vector.load %arg7[%c0_13, %c0_14] : memref<20x4xf32, #tpu.memory_space<vmem>>, vector<20x4xf32>
    %cst_15 = arith.constant dense<0.000000e+00> : vector<25x4xf32>
    %17 = tpu.matmul %8, %16, %cst_15 {dimension_numbers = #tpu.dot_dimension_numbers<[1], [0], [0], [1], [0, 0, 1, 1], [], []>} : vector<25x20xf32>, vector<20x4xf32>, vector<25x4xf32> -> vector<25x4xf32>
    %c0_16 = arith.constant 0 : index
    %c0_17 = arith.constant 0 : index
    %18 = vector.load %arg8[%c0_16, %c0_17] : memref<1x4xf32, #tpu.memory_space<vmem>>, vector<1x4xf32>
    %19 = vector.broadcast %18 : vector<1x4xf32> to vector<25x4xf32>
    %20 = arith.addf %17, %19 : vector<25x4xf32>
    %cst_18 = arith.constant 0.000000e+00 : f32
    %21 = vector.broadcast %cst_18 : f32 to vector<25x4xf32>
    %22 = arith.maximumf %20, %21 : vector<25x4xf32>
    %23 = arith.mulf %15, %22 : vector<25x4xf32>
    %cst_19 = arith.constant 1.000000e+00 : f32
    %24 = vector.broadcast %cst_19 : f32 to vector<25x4xf32>
    %25 = arith.minimumf %23, %24 : vector<25x4xf32>
    %cst_20 = arith.constant 1.000000e+00 : f32
    %26 = vector.broadcast %cst_20 : f32 to vector<25x4xf32>
    %27 = arith.subf %26, %25 : vector<25x4xf32>
    %c0_21 = arith.constant 0 : index
    %c0_22 = arith.constant 0 : index
    %c0_23 = arith.constant 0 : index
    %28 = vector.load %arg2[%c0_21, %c0_22, %c0_23] : memref<1x25x4xf32, #tpu.memory_space<vmem>>, vector<1x25x4xf32>
    %29 = vector.shape_cast %28 : vector<1x25x4xf32> to vector<25x4xf32>
    %30 = arith.mulf %27, %27 : vector<25x4xf32>
    %31 = arith.subf %29, %30 : vector<25x4xf32>
    %cst_24 = arith.constant 0.000000e+00 : f32
    %32 = vector.broadcast %cst_24 : f32 to vector<25x4xf32>
    %33 = arith.maximumf %31, %32 : vector<25x4xf32>
    %c0_25 = arith.constant 0 : index
    %c0_26 = arith.constant 0 : index
    %c0_27 = arith.constant 0 : index
    %34 = vector.load %arg9[%c0_25, %c0_26, %c0_27] : memref<1x25x4xf32, #tpu.memory_space<vmem>>, vector<1x25x4xf32>
    %35 = vector.shape_cast %34 : vector<1x25x4xf32> to vector<25x4xf32>
    %36 = vector.shape_cast %33 : vector<25x4xf32> to vector<1x25x4xf32>
    tpu.vector_store %arg9[%c0_25, %c0_26, %c0_27], %36 {strides = array<i32>} : memref<1x25x4xf32, #tpu.memory_space<vmem>>, vector<1x25x4xf32>,
    return
  }
  func.func @transform_0(%arg0: i32) -> (i32, i32, i32) {
    %c0_i32 = arith.constant 0 : i32
    %c0_i32_0 = arith.constant 0 : i32
    %c0_i32_1 = arith.constant 0 : i32
    return %arg0, %c0_i32, %c0_i32_0 : i32, i32, i32
  }
  func.func @transform_1(%arg0: i32) -> (i32, i32, i32) {
    %c0_i32 = arith.constant 0 : i32
    %c0_i32_0 = arith.constant 0 : i32
    %c0_i32_1 = arith.constant 0 : i32
    return %arg0, %c0_i32, %c0_i32_0 : i32, i32, i32
  }
  func.func @transform_2(%arg0: i32) -> (i32, i32) {
    %c0_i32 = arith.constant 0 : i32
    %c0_i32_0 = arith.constant 0 : i32
    %c0_i32_1 = arith.constant 0 : i32
    return %c0_i32, %c0_i32_0 : i32, i32
  }
  func.func @transform_3(%arg0: i32) -> (i32, i32) {
    %c0_i32 = arith.constant 0 : i32
    %c0_i32_0 = arith.constant 0 : i32
    %c0_i32_1 = arith.constant 0 : i32
    return %c0_i32, %c0_i32_0 : i32, i32
  }
  func.func @transform_4(%arg0: i32) -> (i32, i32) {
    %c0_i32 = arith.constant 0 : i32
    %c0_i32_0 = arith.constant 0 : i32
    %c0_i32_1 = arith.constant 0 : i32
    return %c0_i32, %c0_i32_0 : i32, i32
  }
  func.func @transform_5(%arg0: i32) -> (i32, i32) {
    %c0_i32 = arith.constant 0 : i32
    %c0_i32_0 = arith.constant 0 : i32
    %c0_i32_1 = arith.constant 0 : i32
    return %c0_i32, %c0_i32_0 : i32, i32
  }
  func.func @transform_6(%arg0: i32) -> (i32, i32) {
    %c0_i32 = arith.constant 0 : i32
    %c0_i32_0 = arith.constant 0 : i32
    %c0_i32_1 = arith.constant 0 : i32
    return %c0_i32, %c0_i32_0 : i32, i32
  }
  func.func @transform_7(%arg0: i32) -> (i32, i32) {
    %c0_i32 = arith.constant 0 : i32
    %c0_i32_0 = arith.constant 0 : i32
    %c0_i32_1 = arith.constant 0 : i32
    return %c0_i32, %c0_i32_0 : i32, i32
  }
  func.func @transform_8(%arg0: i32) -> (i32, i32, i32) {
    %c0_i32 = arith.constant 0 : i32
    %c0_i32_0 = arith.constant 0 : i32
    %c0_i32_1 = arith.constant 0 : i32
    return %arg0, %c0_i32, %c0_i32_0 : i32, i32, i32
  }
}

</mosaic_0001>

<bundles_post_ra>
// kernel: tile.10
= control target key start
LH: loop header
LB: loop body
LE: loop exit
PB: predicated region body
PF: predicated region fallthrough
CT: control target
= control target key end

     0   :  { %s28_s0 = inlined_call_operand.vmem [shape: f32[2], index: 0, kind: input, shape index: {}]   ;;  %s29_s1 = inlined_call_operand.vmem [shape: f32[9,2], index: 1, kind: output, shape index: {}]  }
   0x1   :  { %v4_v0 = vld [vmem:[%s28_s0] ss:$0 sm:$0xff] }
   0x2   :  { %5 = vst [vmem:[%s29_s1] sm:$0xff] %v4_v0  ;;  %8 = vst [vmem:[%s29_s1 + $0x8] sm:$0xff] %v4_v0 }

// kernel: mul.14
= control target key start
LH: loop header
LB: loop body
LE: loop exit
PB: predicated region body
PF: predicated region fallthrough
CT: control target
= control target key end

     0   :  { %s77_s10 = smov 16   ;;  %s78_s11 = smov 12   ;;  %vm3_vm0 = vcmask 15360   ;;  %vm9_vm1 = vcmask 146560   ;;  %vm15_vm2 = vcmask 130160   ;;  %vm21_vm3 = vcmask 113760   ;;  %s125_s0 = inlined_call_operand.vmem [shape: f32[9,2], index: 0, kind: input, shape index: {}]   ;;  %s126_s1 = inlined_call_operand.vmem [shape: f32[18], index: 1, kind: output, shape index: {}]  }
   0x1   :  { %v61_v0 = vld [vmem:[%s125_s0 + $0x8] sm:$0x1]   ;;  %v63_v1 = vld [vmem:[%s125_s0 + $0x6] sm:$0x1]   ;;  %v62_v2 = vld [vmem:[%s125_s0 + $0x7] sm:$0x1]  }
   0x2   :  { %7 = vrot.lane.b32.xlu0 %v61_v0, %s77_s10  ;;  %19 = vrot.lane.b32.xlu1 %v63_v1, %s78_s11  ;;  %v64_v3 = vld [vmem:[%s125_s0 + $0x5] sm:$0x1]   ;;  %v2_v4 = vld [vmem:[%s125_s0] sm:$0x1]   ;;  %s79_s18 = smov 14   ;;  %s80_s19 = smov 10  }
   0x3   :  { %4 = vst.msk [vmem:[#allocation0] sm:$0x1] %vm3_vm0, %v2_v4   ;;  %v65_v5 = vld [vmem:[%s125_s0 + $0x4] sm:$0x1]   ;;  %v66_v6 = vld [vmem:[%s125_s0 + $0x3] sm:$0x1]  }
   0x4   :  { %s81_s24 = smov 8   ;;  %s82_s25 = smov 6   ;;  %v67_v7 = vld [vmem:[%s125_s0 + $0x2] sm:$0x1]   ;;  %v68_v8 = vld [vmem:[%s125_s0 + $0x1] sm:$0x1]  }
   0x5   :  { %s83_s0 = smov 4   ;;  %s84_s30 = smov 2   ;;  %vm27_vm4 = vcmask 97360   ;;  %vm33_vm5 = vcmask 80960   ;;  %vm39_vm6 = vcmask 64560   ;;  %vm45_vm7 = vcmask 48160  }
   0x6   :  { %13 = vrot.lane.b32.xlu0 %v62_v2, %s79_s18  ;;  %25 = vrot.lane.b32.xlu1 %v64_v3, %s80_s19  ;;  %vm51_vm8 = vcmask 31760  }
   0xa   :  { %31 = vrot.lane.b32.xlu0 %v65_v5, %s81_s24  ;;  %37 = vrot.lane.b32.xlu1 %v66_v6, %s82_s25 }
   0xe   :  { %43 = vrot.lane.b32.xlu0 %v67_v7, %s83_s0  ;;  %49 = vrot.lane.b32.xlu1 %v68_v8, %s84_s30 }
  0x74   :  { %v8_v9 = vpop.permute.xlu0 %7   ;;  %v20_v10 = vpop.permute.xlu1 %19  }
  0x75   :  { %10 = vst.msk [vmem:[#allocation0] sm:$0x1] %vm9_vm1, %v8_v9  }
  0x78   :  { %v14_v11 = vpop.permute.xlu0 %13   ;;  %v26_v12 = vpop.permute.xlu1 %25  }
  0x79   :  { %16 = vst.msk [vmem:[#allocation0] sm:$0x1] %vm15_vm2, %v14_v11  }
  0x7a   :  { %22 = vst.msk [vmem:[#allocation0] sm:$0x1] %vm21_vm3, %v20_v10  }
  0x7b   :  { %28 = vst.msk [vmem:[#allocation0] sm:$0x1] %vm27_vm4, %v26_v12  }
  0x7c   :  { %v32_v13 = vpop.permute.xlu0 %31   ;;  %v38_v14 = vpop.permute.xlu1 %37  }
  0x7d   :  { %34 = vst.msk [vmem:[#allocation0] sm:$0x1] %vm33_vm5, %v32_v13  }
  0x7e   :  { %40 = vst.msk [vmem:[#allocation0] sm:$0x1] %vm39_vm6, %v38_v14  }
  0x80   :  { %v44_v15 = vpop.permute.xlu0 %43   ;;  %v50_v16 = vpop.permute.xlu1 %49  }
  0x81   :  { %46 = vst.msk [vmem:[#allocation0] sm:$0x1] %vm45_vm7, %v44_v15  }
  0x82   :  { %52 = vst.msk [vmem:[#allocation0] sm:$0x1] %vm51_vm8, %v50_v16  }
  0x89   :  { %v57_v17 = vld [vmem:[#allocation0] sm:$0x1] }
  0x8a   :  { %60 = vst [vmem:[%s126_s1] sm:$0x1] %v57_v17 }

// kernel: _lambda_.1
= control target key start
LH: loop header
LB: loop body
LE: loop exit
PB: predicated region body
PF: predicated region fallthrough
CT: control target
= control target key end

     0   :  { %s956_s27 = smov 0   ;;  %s1074_s0 = inlined_call_operand.vmem [shape: f32[2,25,100], index: 0, kind: input, shape index: {}]   ;;  %s1075_s1 = inlined_call_operand.vmem [shape: f32[2,25,4], index: 1, kind: input, shape index: {}]   ;;  %s1076_s2 = inlined_call_operand.vmem [shape: f32[100,20], index: 2, kind: input, shape index: {}]   ;;  %s1077_s3 = inlined_call_operand.vmem [shape: f32[1,20], index: 3, kind: input, shape index: {}]   ;;  %s1078_s4 = inlined_call_operand.vmem [shape: f32[20,4], index: 4, kind: input, shape index: {}]   ;;  %s1079_s5 = inlined_call_operand.vmem [shape: f32[1,4], index: 5, kind: input, shape index: {}]   ;;  %s1080_s6 = inlined_call_operand.vmem [shape: f32[20,4], index: 6, kind: input, shape index: {}]   ;;  %s1081_s7 = inlined_call_operand.vmem [shape: f32[1,4], index: 7, kind: input, shape index: {}]   ;;  %s1082_s8 = inlined_call_operand.vmem [shape: f32[2,25,4], index: 8, kind: output, shape index: {}]  }
   0x1 LB: > { %s774_s28 = sadd.s32 4294967295, %s909_s27   ;;  %p778_p0 = scmp.ge.s32.totalorder %s909_s27, 1  ;;  %s909_s27 = sphi %s956_s27, %s18_s27  }
   0x2   : > { %p272_p1 = scmp.lt.s32.totalorder %s909_s27, 3 }
   0x4   : > { %p273_p2 = pnand %p778_p0, %p272_p1 }
   0x5   : > { %p311_p3 = scmp.lt.s32.totalorder (!%p273_p2), %s774_s28, 1 }
   0x6   : > { %276 = sbr.rel (%p273_p2) target bundleno = 462 (0x1ce), region = 52 }
   0xb   : > { %v342_v0 = vld [vmem:[%s1076_s2 + $0x60] sm:$0xf]  ;;  %vm363_vm0 = vcmask 1043456   ;;  %v341_v1 = vld [vmem:[%s1076_s2 + $0x58] sm:$0xff]  ;;  %v340_v2 = vld [vmem:[%s1076_s2 + $0x50] sm:$0xff]  ;;  %s1084_s28 = smov (!%p311_p3, %s774_s28), 1 }
   0xc   : > { %839 = vmatprep.subr.msk.mxu0 %vm363_vm0, %v342_v0  ;;  %v339_v3 = vld [vmem:[%s1076_s2 + $0x48] sm:$0xff]  ;;  %s978_s15 = sshll.u32 %s1084_s28, 5  ;;  %vm350_vm1 = vcmask 818176   ;;  %v338_v4 = vld [vmem:[%s1076_s2 + $0x40] sm:$0xff]  ;;  %v337_v6 = vld [vmem:[%s1076_s2 + $0x38] sm:$0xff]  ;;  %vm466_vm2 = vcmask 162816  }
   0xd   : > { %840 = vmatpush3.msk.msra.mxu0 %vm363_vm0, %v342_v0  ;;  %s984_s18 = scalar_lea.vmem %s1074_s0, %s978_s15  ;;  %v336_v7 = vld [vmem:[%s1076_s2 + $0x30] sm:$0xff]  ;;  %v335_v8 = vld [vmem:[%s1076_s2 + $0x28] sm:$0xff]  ;;  %v334_v9 = vld [vmem:[%s1076_s2 + $0x20] sm:$0xff]  ;;  %s320_s17 = scalar_lea.vmem %s1075_s1, %s978_s15  ;;  %vm701_vm3 = vcmask 31744   ;;  %vm705_vm4 = vcmask 24576  }
   0xe   : > { %841 = vmatprep.subr.mxu0 %v341_v1  ;;  %v326_v5 = vld [vmem:[%s984_s18] sm:$0xff]  ;;  %v333_v10 = vld [vmem:[%s1076_s2 + $0x18] sm:$0xff]  ;;  %v332_v11 = vld [vmem:[%s1076_s2 + $0x10] sm:$0xff]  ;;  %s325_s21 = scalar_lea.vmem %s1082_s8, %s978_s15 }
   0xf   : > { %842 = vmatpush3.msra.mxu0 %v341_v1  ;;  %865 = vmatprep.mubr.msk.f32.mxu0 %vm350_vm1, %v326_v5  ;;  %v331_v12 = vld [vmem:[%s1076_s2 + $0x8] sm:$0xff]  ;;  %v330_v13 = vld [vmem:[%s1076_s2] sm:$0xff]  ;;  %v328_v15 = vld [vmem:[%s984_s18 + $0x10] sm:$0xff] }
  0x10   : > { %843 = vmatprep.subr.mxu0 %v340_v2  ;;  %v327_v14 = vld [vmem:[%s984_s18 + $0x8] sm:$0xff]  ;;  %v329_v16 = vld [vmem:[%s984_s18 + $0x18] sm:$0x1]  ;;  %v458_v17 = vld [vmem:[%s1078_s4 + $0x10] sm:$0xf] }
  0x11   : > { %844 = vmatpush3.msra.mxu0 %v340_v2  ;;  %871 = vmatprep.subr.msk.mxu1 %vm363_vm0, %v458_v17  ;;  %v457_v18 = vld [vmem:[%s1078_s4 + $0x8] sm:$0xff]  ;;  %v456_v19 = vld [vmem:[%s1078_s4] sm:$0xff]  ;;  %v573_v20 = vld [vmem:[%s1080_s6 + $0x10] sm:$0xf] }
  0x12   : > { %845 = vmatprep.subr.mxu0 %v339_v3  ;;  %872 = vmatpush3.msk.msra.mxu1 %vm363_vm0, %v458_v17  ;;  %v785_v21 = vld [vmem:[%s1077_s3] ss:$0 sm:$0xff]  ;;  %v572_v32 = vld [vmem:[%s1080_s6 + $0x8] sm:$0xff] }
  0x13   : > { %846 = vmatpush3.msra.mxu0 %v339_v3  ;;  %873 = vmatprep.subr.mxu1 %v457_v18  ;;  %v571_v34 = vld [vmem:[%s1080_s6] sm:$0xff] }
  0x14   : > { %847 = vmatprep.subr.mxu0 %v338_v4  ;;  %874 = vmatpush3.msra.mxu1 %v457_v18  ;;  %v791_v38 = vld [vmem:[%s1079_s5] ss:$0 sm:$0xff] }
  0x15   : > { %848 = vmatpush3.msra.mxu0 %v338_v4  ;;  %875 = vmatprep.subr.mxu1 %v456_v19  ;;  %v797_v41 = vld [vmem:[%s1081_s7] ss:$0 sm:$0xff]  ;;  %v686_v4 = vld [vmem:[%s320_s17 + $0x8] sm:$0xff] }
  0x16   : > { %849 = vmatprep.subr.mxu0 %v337_v6  ;;  %876 = vmatpush3.msra.mxu1 %v456_v19  ;;  %v687_v19 = vld [vmem:[%s320_s17 + $0x10] sm:$0xff] }
  0x17   : > { %850 = vmatpush3.msra.mxu0 %v337_v6  ;;  %883 = vmatprep.subr.msk.mxu1 %vm363_vm0, %v573_v20 }
  0x18   : > { %851 = vmatprep.subr.mxu0 %v336_v7 }
  0x19   : > { %852 = vmatpush3.msra.mxu0 %v336_v7 }
  0x1a   : > { %853 = vmatprep.subr.mxu0 %v335_v8 }
  0x1b   : > { %854 = vmatpush3.msra.mxu0 %v335_v8 }
  0x1c   : > { %855 = vmatprep.subr.mxu0 %v334_v9 }
  0x1d   : > { %856 = vmatpush3.msra.mxu0 %v334_v9  ;;  %v685_v9 = vld [vmem:[%s320_s17] sm:$0xff] }
  0x1e   : > { %857 = vmatprep.subr.mxu0 %v333_v10 }
  0x1f   : > { %858 = vmatpush3.msra.mxu0 %v333_v10 }
  0x20   : > { %859 = vmatprep.subr.mxu0 %v332_v11 }
  0x21   : > { %860 = vmatpush3.msra.mxu0 %v332_v11 }
  0x22   : > { %861 = vmatprep.subr.mxu0 %v331_v12 }
  0x23   : > { %862 = vmatpush3.msra.mxu0 %v331_v12 }
  0x24   : > { %863 = vmatprep.subr.mxu0 %v330_v13 }
  0x25   : > { %864 = vmatpush3.msra.mxu0 %v330_v13 }
  0x26   : > { %866 = vmatmul.mubr.msk.f32.vlgmr.msra.gmra.mxu0 %vm350_vm1, %v327_v14  ;;  %v688_v14 = vld [vmem:[%s320_s17 + $0x18] sm:$0x1] }
  0x27   : > { %868 = vmatprep.mubr.msk.f32.mxu0 %vm350_vm1, %v328_v15 }
  0x2a   : > { %869 = vmatmul.mubr.msk.f32.gmra.mxu0 %vm350_vm1, %v329_v16 }
  0xe6   : > { %v867_v22 = vpop.f32.mrf.mxu0 }
  0xe7   : > { %v439_v23 = vadd.f32 %v867_v22, %v785_v21 }
  0xe8   : > { %v433_v24 = vpop.f32.mrf.mxu0 }
  0xe9   : > { %v434_v25 = vadd.f32 %v785_v21, %v433_v24  ;;  %v453_v28 = vmax.f32 %v439_v23, 0.0 }
  0xea   : > { %v870_v26 = vpop.f32.mrf.mxu0 }
  0xeb   : > { %v452_v27 = vmax.f32 %v434_v25, 0.0  ;;  %v449_v29 = vadd.f32 %v870_v26, %v785_v21 }
  0xec   : > { %v443_v30 = vpop.f32.mrf.mxu0 }
  0xed   : > { %v444_v31 = vadd.f32 %v785_v21, %v443_v30  ;;  %877 = vmatprep.mubr.msk.f32.mxu1 %vm466_vm2, %v452_v27  ;;  %v455_v35 = vmax.f32 %v449_v29, 0.0 }
  0xee   : > { %878 = vmatmul.mubr.msk.f32.vlgmr.msra.gmra.mxu1 %vm466_vm2, %v453_v28 }
  0xef   : > { %v454_v33 = vmax.f32 %v444_v31, 0.0  ;;  %884 = vmatpush3.msk.msra.mxu1 %vm363_vm0, %v573_v20 }
  0xf0   : > { %885 = vmatprep.subr.mxu1 %v572_v32 }
  0xf1   : > { %880 = vmatprep.mubr.msk.f32.mxu1 %vm466_vm2, %v454_v33  ;;  %886 = vmatpush3.msra.mxu1 %v572_v32 }
  0xf2   : > { %881 = vmatmul.mubr.msk.f32.gmra.mxu1 %vm466_vm2, %v455_v35  ;;  %887 = vmatprep.subr.mxu1 %v571_v34 }
  0xf3   : > { %889 = vmatprep.mubr.msk.f32.mxu1 %vm466_vm2, %v452_v27  ;;  %888 = vmatpush3.msra.mxu1 %v571_v34 }
  0xf6   : > { %890 = vmatmul.mubr.msk.f32.vlgmr.msra.gmra.mxu1 %vm466_vm2, %v453_v28 }
  0xf7   : > { %892 = vmatprep.mubr.msk.f32.mxu1 %vm466_vm2, %v454_v33 }
  0xfa   : > { %893 = vmatmul.mubr.msk.f32.gmra.mxu1 %vm466_vm2, %v455_v35 }
 0x1ae   : > { %v879_v36 = vpop.f32.mrf.mxu1 }
 0x1af   : > { %v554_v42 = vadd.f32 %v879_v36, %v791_v38 }
 0x1b0   : > { %v548_v37 = vpop.f32.mrf.mxu1 }
 0x1b1   : > { %v549_v44 = vadd.f32 %v791_v38, %v548_v37  ;;  %v568_v48 = vmax.f32 %v554_v42, 0.0 }
 0x1b2   : > { %v882_v39 = vpop.f32.mrf.mxu1 }
 0x1b3   : > { %v564_v46 = vadd.f32 %v882_v39, %v791_v38  ;;  %v567_v53 = vmax.f32 %v549_v44, 0.0 }
 0x1b4   : > { %v558_v40 = vpop.f32.mrf.mxu1 }
 0x1b5   : > { %v559_v51 = vadd.f32 %v791_v38, %v558_v40  ;;  %v570_v57 = vmax.f32 %v564_v46, 0.0 }
 0x1b6   : > { %v891_v43 = vpop.f32.mrf.mxu1 }
 0x1b7   : > { %v656_v45 = vadd.f32 %v891_v43, %v797_v41  ;;  %v569_v63 = vmax.f32 %v559_v51, 0.0 }
 0x1b8   : > { %v650_v47 = vpop.f32.mrf.mxu1 }
 0x1b9   : > { %v670_v49 = vmax.f32 %v656_v45, 0.0  ;;  %v651_v50 = vadd.f32 %v797_v41, %v650_v47 }
 0x1ba   : > { %v894_v52 = vpop.f32.mrf.mxu1 }
 0x1bb   : > { %v674_v54 = vmul.f32 %v670_v49, %v568_v48  ;;  %v669_v55 = vmax.f32 %v651_v50, 0.0  ;;  %v666_v56 = vadd.f32 %v894_v52, %v797_v41 }
 0x1bc   : > { %v660_v58 = vpop.f32.mrf.mxu1 }
 0x1bd   : > { %v678_v59 = vmin.f32 %v674_v54, 1.0  ;;  %v673_v60 = vmul.f32 %v669_v55, %v567_v53  ;;  %v672_v61 = vmax.f32 %v666_v56, 0.0  ;;  %v661_v62 = vadd.f32 %v797_v41, %v660_v58 }
 0x1bf   : > { %v682_v0 = vsub.f32 1.0, %v678_v59  ;;  %v677_v1 = vmin.f32 %v673_v60, 1.0  ;;  %v676_v2 = vmul.f32 %v672_v61, %v570_v57  ;;  %v671_v3 = vmax.f32 %v661_v62, 0.0 }
 0x1c1   : > { %v690_v5 = vmul.f32 %v682_v0, %v682_v0  ;;  %v681_v6 = vsub.f32 1.0, %v677_v1  ;;  %v680_v7 = vmin.f32 %v676_v2, 1.0  ;;  %v675_v8 = vmul.f32 %v671_v3, %v569_v63 }
 0x1c3   : > { %v694_v10 = vsub.f32 %v686_v4, %v690_v5  ;;  %v689_v11 = vmul.f32 %v681_v6, %v681_v6  ;;  %v684_v12 = vsub.f32 1.0, %v680_v7  ;;  %v679_v13 = vmin.f32 %v675_v8, 1.0 }
 0x1c5   : > { %v698_v15 = vmax.f32 %v694_v10, 0.0  ;;  %v693_v16 = vsub.f32 %v685_v9, %v689_v11  ;;  %v692_v17 = vmul.f32 %v684_v12, %v684_v12  ;;  %v683_v18 = vsub.f32 1.0, %v679_v13 }
 0x1c7   : > { %703 = vst.msk [vmem:[%s325_s21 + $0x8] sm:$0xff] %vm701_vm3, %v698_v15  ;;  %v697_v20 = vmax.f32 %v693_v16, 0.0  ;;  %v696_v21 = vsub.f32 %v688_v14, %v692_v17  ;;  %v691_v22 = vmul.f32 %v683_v18, %v683_v18 }
 0x1c9   : > { %702 = vst.msk [vmem:[%s325_s21] sm:$0xff] %vm701_vm3, %v697_v20  ;;  %v700_v23 = vmax.f32 %v696_v21, 0.0  ;;  %v695_v24 = vsub.f32 %v687_v19, %v691_v22 }
 0x1cb   : > { %706 = vst.msk [vmem:[%s325_s21 + $0x18] sm:$0x1] %vm705_vm4, %v700_v23  ;;  %v699_v25 = vmax.f32 %v695_v24, 0.0 }
 0x1cd   : > { %704 = vst.msk [vmem:[%s325_s21 + $0x10] sm:$0xff] %vm701_vm3, %v699_v25 }
 0x1ce PF: > { %s18_s27 = sadd.s32 1, %s909_s27  }
 0x1cf   : > { %p15_p4 = scmp.ge.s32.totalorder %s18_s27, 4  }
 0x1d1   :  { %17 = sbr.rel (!%p15_p4) target bundleno = 1 (0x1), region = 85 }

</bundles_post_ra>
